<compile_context>
chip_gen: v7x
topology: tpu7x:2x2x1
jax: 0.10.0
libtpu: 0.0.40
codegen_flags: <defaults>
</compile_context>

<pallas_src>
import math
from functools import partial

import jax
import jax.numpy as jnp
from jax.experimental import pallas as pl
from jax.experimental.pallas import tpu as pltpu


def _round_up(x, m):
    return ((x + m - 1) // m) * m


def _vmem_bytes_physical():
    try:
        info = pltpu.get_tpu_info()
        for name in ("vmem_capacity_bytes", "vmem_size_bytes", "vmem_bytes"):
            v = getattr(info, name, None)
            if v:
                return int(v)
    except Exception:
        pass
    return 64 * 1024 * 1024  # conservative (v7x physical VMEM per TC)


def _tile_bytes(bt, rows, cols, itemsize):
    # VMEM blocks are stored (8,128)-tiled on the last two dims.
    return bt * _round_up(max(rows, 1), 8) * _round_up(max(cols, 1), 128) * itemsize


def _attention_agger_kernel(q_ref, k_ref, v_ref, fill_ref,
                            wq_ref, bq_ref, wk_ref, bk_ref,
                            o_ref, kp_ref, *, approx_recip):
    Bt, tq, D = q_ref.shape
    _, Lk, _ = k_ref.shape
    M = wq_ref.shape[-1]

    # ---- K projection hoisted out of the query-tile axis --------------------
    # qi (grid axis 1, innermost, "arbitrary") revisits the same batch block; kp
    # is computed once per batch block and reused for every query tile.
    @pl.when(pl.program_id(1) == 0)
    def _():
        k2 = k_ref[...].reshape(Bt * Lk, D)          # free: Lk is a sublane multiple
        kp = jnp.dot(k2, wk_ref[...],
                     preferred_element_type=jnp.float32) + bk_ref[...]
        kp_ref[...] = kp.reshape(Bt, Lk, M).astype(kp_ref.dtype)

    # ---- Q projection (1/sqrt(Mdim) already folded into wq/bq) --------------
    q2 = q_ref[...].reshape(Bt * tq, D)
    qp = (jnp.dot(q2, wq_ref[...], preferred_element_type=jnp.float32)
          + bq_ref[...]).reshape(Bt, tq, M)

    # ---- scores: batched, contraction over M (no explicit kp transpose) -----
    attn = jnp.einsum('bqm,bkm->bqk', qp.astype(kp_ref.dtype), kp_ref[...],
                      preferred_element_type=jnp.float32)      # (Bt, tq, Lk) f32

    # masked_fill(attn, mask, -(1<<32)) == attn*keep + fill, with fill in
    # {0, -2^32} and keep = 1 + fill*2^-32 in {1, 0} (all exact in f32).
    fill = fill_ref[...]                                        # (Bt, 1, Lk)
    keep = 1.0 + fill * jnp.float32(2.0 ** -32)
    attn = attn * keep + fill

    # ---- softmax over keys (f32); divide folded into output normalization ---
    m = jnp.max(attn, axis=-1, keepdims=True)
    e = jnp.exp(attn - m)
    s = jnp.sum(e, axis=-1, keepdims=True)                      # (Bt, tq, 1)

    out = jnp.einsum('bqk,bkv->bqv', e.astype(v_ref.dtype), v_ref[...],
                     preferred_element_type=jnp.float32)        # (Bt, tq, Vdim)
    o_ref[...] = (out * pl.reciprocal(s, approx=approx_recip)).astype(o_ref.dtype)


def attention_agger(Q, K, V, mask, WQ, bQ, WK, bK, Mdim, *,
                    compute_dtype=jnp.bfloat16):
    """Q: (B, Lq, Qdim), K: (B, Lk, Qdim), V: (B, Lk, Vdim),
       mask: (B, Lk) bool/int (nonzero = masked out) or None,
       WQ/WK: PyTorch Linear weights of shape (Mdim, Qdim), bQ/bK: (Mdim,)."""
    Q = jnp.asarray(Q)
    K = jnp.asarray(K)
    V = jnp.asarray(V)
    B, Lq, Qdim = Q.shape
    _, Lk, _ = K.shape
    Vdim = V.shape[-1]
    out_dtype = V.dtype

    cbytes = jnp.dtype(compute_dtype).itemsize
    obytes = jnp.dtype(out_dtype).itemsize
    sub = 8 if cbytes == 4 else 16                  # sublane multiple (f32 / bf16)
    Lq_sub = _round_up(Lq, sub)
    Lk_pad = _round_up(Lk, sub)

    # ---- VMEM-budget-aware tile selection -----------------------------------
    phys = _vmem_bytes_physical()
    vmem_limit = int(phys * 0.85)
    budget = vmem_limit // 2                        # headroom for compiler temps

    def step_vmem(bt, tq):
        b = 0
        b += 2 * _tile_bytes(bt, tq, Qdim, cbytes)       # Q   (double-buffered)
        b += 2 * _tile_bytes(bt, Lk_pad, Qdim, cbytes)   # K
        b += 2 * _tile_bytes(bt, Lk_pad, Vdim, cbytes)   # V
        b += 2 * _tile_bytes(bt, 1, Lk_pad, 4)           # fill
        b += 4 * _tile_bytes(1, Qdim, Mdim, cbytes)      # WQ, WK
        b += 4 * _tile_bytes(1, 1, Mdim, 4)              # biases (f32)
        b += 2 * _tile_bytes(bt, tq, Vdim, obytes)       # out
        b += _tile_bytes(bt, Lk_pad, Mdim, cbytes)       # kp scratch
        b += 2 * _tile_bytes(bt, tq, Lk_pad, 4)          # attn / e intermediates
        b += _tile_bytes(bt, tq, Mdim, 4)                # qp intermediate
        return b

    # Grow tq first (fills the MXU row dim; up to 256 on v6e/v7x), then Bt.
    base = [t for t in (256, 128, 64, 32, 16, 8) if t % sub == 0]
    tq_cands = ([Lq_sub] if Lq_sub <= 256 else []) + \
               [t for t in base if t <= max(Lq_sub, sub)]
    tq_cands = tq_cands or [sub]
    tq = next((t for t in tq_cands if step_vmem(1, t) <= budget), tq_cands[-1])

    bmax = 1
    while bmax < min(B, 8):
        bmax *= 2
    Bt = next((b for b in (8, 4, 2, 1)
               if b <= bmax and step_vmem(b, tq) <= budget), 1)

    B_pad = _round_up(B, Bt)
    Lq_pad = _round_up(Lq, tq)

    # ---- wrapper-side constant folding / dtype prep --------------------------
    scale = 1.0 / math.sqrt(Mdim)
    wq_t = (jnp.asarray(WQ, jnp.float32).T * scale).astype(compute_dtype)   # (Qdim, Mdim)
    wk_t = jnp.asarray(WK, jnp.float32).T.astype(compute_dtype)             # (Qdim, Mdim)
    bq2 = (jnp.asarray(bQ, jnp.float32) * scale).reshape(1, Mdim)           # f32 (added post-acc)
    bk2 = jnp.asarray(bK, jnp.float32).reshape(1, Mdim)

    Qx = jnp.pad(Q, ((0, B_pad - B), (0, Lq_pad - Lq), (0, 0))).astype(compute_dtype)
    Kx = jnp.pad(K, ((0, B_pad - B), (0, Lk_pad - Lk), (0, 0))).astype(compute_dtype)
    Vx = jnp.pad(V, ((0, B_pad - B), (0, Lk_pad - Lk), (0, 0))).astype(compute_dtype)

    if mask is None:
        mask_b = jnp.zeros((B, Lk), dtype=bool)
    else:
        mask_b = jnp.asarray(mask) != 0
    mask_full = jnp.zeros((B_pad, Lk_pad), dtype=bool)
    mask_full = mask_full.at[:B, :Lk].set(mask_b)
    if Lk_pad > Lk:
        mask_full = mask_full.at[:, Lk:].set(True)       # padded keys are masked out
    fill = jnp.where(mask_full, jnp.float32(-(1 << 32)), jnp.float32(0.0))[:, None, :]

    grid = (B_pad // Bt, Lq_pad // tq)

    # ---- cost estimate (advisory, for XLA scheduling around the call) --------
    flops = 2 * B_pad * (Lk_pad * Qdim * Mdim            # K projection (per batch block)
                         + Lq_pad * Qdim * Mdim          # Q projection
                         + Lq_pad * Lk_pad * Mdim        # scores
                         + Lq_pad * Lk_pad * Vdim)       # PV
    transcendentals = B_pad * Lq_pad * Lk_pad
    bytes_accessed = (Qx.size * cbytes + Kx.size * cbytes + Vx.size * cbytes
                      + fill.size * 4
                      + (wq_t.size + wk_t.size) * cbytes
                      + (bq2.size + bk2.size) * 4
                      + B_pad * Lq_pad * Vdim * obytes)
    cost = pl.CostEstimate(flops=int(flops), transcendentals=int(transcendentals),
                           bytes_accessed=int(bytes_accessed))

    out_padded = pl.pallas_call(
        partial(_attention_agger_kernel, approx_recip=(cbytes < 4)),
        out_shape=jax.ShapeDtypeStruct((B_pad, Lq_pad, Vdim), out_dtype),
        grid_spec=pltpu.PrefetchScalarGridSpec(
            num_scalar_prefetch=0,
            grid=grid,
            in_specs=[
                pl.BlockSpec((Bt, tq, Qdim), lambda bi, qi: (bi, qi, 0)),      # Q
                pl.BlockSpec((Bt, Lk_pad, Qdim), lambda bi, qi: (bi, 0, 0)),   # K
                pl.BlockSpec((Bt, Lk_pad, Vdim), lambda bi, qi: (bi, 0, 0)),   # V
                pl.BlockSpec((Bt, 1, Lk_pad), lambda bi, qi: (bi, 0, 0)),      # fill
                pl.BlockSpec((Qdim, Mdim), lambda bi, qi: (0, 0)),             # WQ^T * scale
                pl.BlockSpec((1, Mdim), lambda bi, qi: (0, 0)),                # bQ * scale
                pl.BlockSpec((Qdim, Mdim), lambda bi, qi: (0, 0)),             # WK^T
                pl.BlockSpec((1, Mdim), lambda bi, qi: (0, 0)),                # bK
            ],
            out_specs=pl.BlockSpec((Bt, tq, Vdim), lambda bi, qi: (bi, qi, 0)),
            scratch_shapes=[pltpu.VMEM((Bt, Lk_pad, Mdim), compute_dtype)],    # kp cache
        ),
        compiler_params=pltpu.CompilerParams(
            dimension_semantics=("parallel", "arbitrary"),
            vmem_limit_bytes=vmem_limit,
        ),
        cost_estimate=cost,
    )(Qx, Kx, Vx, fill, wq_t, bq2, wk_t, bk2)

    return out_padded[:B, :Lq, :]


def attention_agger_ref(Q, K, V, mask, WQ, bQ, WK, bK, Mdim):
    Qp = Q @ WQ.T + bQ
    Kp = K @ WK.T + bK
    attn = (Qp @ jnp.swapaxes(Kp, -1, -2)) / math.sqrt(Mdim)
    if mask is not None:
        attn = jnp.where(mask[:, None, :] != 0, jnp.float32(-(1 << 32)), attn)
    attn = jax.nn.softmax(attn, axis=-1)
    return attn @ V


if __name__ == "__main__":
    key = jax.random.PRNGKey(0)
    B, Lq, Lk = 2, 8, 8
    Qdim, Mdim, Vdim = 32, 32, 32

    k1, k2, k3, k4, k5, k6, k7 = jax.random.split(key, 7)
    Q = jax.random.normal(k1, (B, Lq, Qdim), dtype=jnp.float32)
    K = jax.random.normal(k2, (B, Lk, Qdim), dtype=jnp.float32)
    V = jax.random.normal(k3, (B, Lk, Vdim), dtype=jnp.float32)
    # PyTorch Linear shapes: weight (Mdim, Qdim), bias (Mdim,)
    bound = 1.0 / math.sqrt(Qdim)
    WQ = jax.random.uniform(k4, (Mdim, Qdim), minval=-bound, maxval=bound, dtype=jnp.float32)
    bQ = jax.random.uniform(k5, (Mdim,), minval=-bound, maxval=bound, dtype=jnp.float32)
    WK = jax.random.uniform(k6, (Mdim, Qdim), minval=-bound, maxval=bound, dtype=jnp.float32)
    bK = jax.random.uniform(k7, (Mdim,), minval=-bound, maxval=bound, dtype=jnp.float32)
    # mask: nonzero means masked-out position; mask last two keys of batch 1
    mask = jnp.zeros((B, Lk), dtype=jnp.int32).at[1, -2:].set(1)

    ref = attention_agger_ref(Q, K, V, mask, WQ, bQ, WK, bK, Mdim)

    # f32 path: tight semantics check vs the reference.
    out_f32 = jax.block_until_ready(
        attention_agger(Q, K, V, mask, WQ, bQ, WK, bK, Mdim, compute_dtype=jnp.float32))
    assert out_f32.shape == (B, Lq, Vdim)
    assert jnp.allclose(out_f32, ref, atol=2e-4, rtol=2e-4), "f32 path mismatch vs reference"

    # bf16 path (default / production): MXU-native operands, f32 accumulation.
    out_bf16 = jax.block_until_ready(
        attention_agger(Q, K, V, mask, WQ, bQ, WK, bK, Mdim))
    assert out_bf16.shape == (B, Lq, Vdim)
    assert jnp.allclose(out_bf16, ref, atol=5e-2, rtol=5e-2), "bf16 path mismatch vs reference"

    print("KERNEL_OK")
</pallas_src>

<mosaic_0001>
module attributes {stable_mosaic.version = 11 : i64} {
  func.func @_attention_agger_kernel(%arg0: i32, %arg1: i32, %arg2: memref<2x8x32xf32, #tpu.memory_space<vmem>>, %arg3: memref<2x8x32xf32, #tpu.memory_space<vmem>>, %arg4: memref<2x8x32xf32, #tpu.memory_space<vmem>>, %arg5: memref<2x1x8xf32, #tpu.memory_space<vmem>>, %arg6: memref<32x32xf32, #tpu.memory_space<vmem>>, %arg7: memref<1x32xf32, #tpu.memory_space<vmem>>, %arg8: memref<32x32xf32, #tpu.memory_space<vmem>>, %arg9: memref<1x32xf32, #tpu.memory_space<vmem>>, %arg10: memref<2x8x32xf32, #tpu.memory_space<vmem>>, %arg11: memref<2x8x32xf32, #tpu.memory_space<vmem>>) attributes {dimension_semantics = [#tpu.dimension_semantics<parallel>, #tpu.dimension_semantics<arbitrary>], iteration_bounds = array<i64: 1, 1>, scalar_prefetch = 0 : i64, scratch_operands = 1 : i64, tpu.core_type = #tpu.core_type<tc>, window_params = [{transform_indices = @transform_0, window_bounds = array<i64: 2, 8, 32>}, {transform_indices = @transform_1, window_bounds = array<i64: 2, 8, 32>}, {transform_indices = @transform_2, window_bounds = array<i64: 2, 8, 32>}, {transform_indices = @transform_3, window_bounds = array<i64: 2, 1, 8>}, {pipeline_mode = #tpu.pipeline_mode<synchronous>, transform_indices = @transform_4, window_bounds = array<i64: 32, 32>}, {pipeline_mode = #tpu.pipeline_mode<synchronous>, transform_indices = @transform_5, window_bounds = array<i64: 1, 32>}, {pipeline_mode = #tpu.pipeline_mode<synchronous>, transform_indices = @transform_6, window_bounds = array<i64: 32, 32>}, {pipeline_mode = #tpu.pipeline_mode<synchronous>, transform_indices = @transform_7, window_bounds = array<i64: 1, 32>}, {transform_indices = @transform_8, window_bounds = array<i64: 2, 8, 32>}]} {
    %c0_i32 = arith.constant 0 : i32
    %0 = arith.cmpi eq, %arg1, %c0_i32 : i32
    %1 = arith.extui %0 : i1 to i32
    %c0_i32_0 = arith.constant 0 : i32
    %2 = arith.cmpi ne, %1, %c0_i32_0 : i32
    scf.if %2 {
      %c0_25 = arith.constant 0 : index
      %c0_26 = arith.constant 0 : index
      %c0_27 = arith.constant 0 : index
      %35 = vector.load %arg3[%c0_25, %c0_26, %c0_27] : memref<2x8x32xf32, #tpu.memory_space<vmem>>, vector<2x8x32xf32>
      %36 = vector.shape_cast %35 : vector<2x8x32xf32> to vector<16x32xf32>
      %c0_28 = arith.constant 0 : index
      %c0_29 = arith.constant 0 : index
      %37 = vector.load %arg8[%c0_28, %c0_29] : memref<32x32xf32, #tpu.memory_space<vmem>>, vector<32x32xf32>
      %cst_30 = arith.constant dense<0.000000e+00> : vector<16x32xf32>
      %38 = tpu.matmul %36, %37, %cst_30 {dimension_numbers = #tpu.dot_dimension_numbers<[1], [0], [0], [1], [0, 0, 1, 1], [], []>} : vector<16x32xf32>, vector<32x32xf32>, vector<16x32xf32> -> vector<16x32xf32>
      %c0_31 = arith.constant 0 : index
      %c0_32 = arith.constant 0 : index
      %39 = vector.load %arg9[%c0_31, %c0_32] : memref<1x32xf32, #tpu.memory_space<vmem>>, vector<1x32xf32>
      %40 = vector.broadcast %39 : vector<1x32xf32> to vector<16x32xf32>
      %41 = arith.addf %38, %40 : vector<16x32xf32>
      %42 = vector.shape_cast %41 : vector<16x32xf32> to vector<2x8x32xf32>
      %c0_33 = arith.constant 0 : index
      %c0_34 = arith.constant 0 : index
      %c0_35 = arith.constant 0 : index
      %43 = vector.load %arg11[%c0_33, %c0_34, %c0_35] : memref<2x8x32xf32, #tpu.memory_space<vmem>>, vector<2x8x32xf32>
      tpu.vector_store %arg11[%c0_33, %c0_34, %c0_35], %42 {strides = array<i32>} : memref<2x8x32xf32, #tpu.memory_space<vmem>>, vector<2x8x32xf32>,
    } else {
    }
    %c0 = arith.constant 0 : index
    %c0_1 = arith.constant 0 : index
    %c0_2 = arith.constant 0 : index
    %3 = vector.load %arg2[%c0, %c0_1, %c0_2] : memref<2x8x32xf32, #tpu.memory_space<vmem>>, vector<2x8x32xf32>
    %4 = vector.shape_cast %3 : vector<2x8x32xf32> to vector<16x32xf32>
    %c0_3 = arith.constant 0 : index
    %c0_4 = arith.constant 0 : index
    %5 = vector.load %arg6[%c0_3, %c0_4] : memref<32x32xf32, #tpu.memory_space<vmem>>, vector<32x32xf32>
    %cst = arith.constant dense<0.000000e+00> : vector<16x32xf32>
    %6 = tpu.matmul %4, %5, %cst {dimension_numbers = #tpu.dot_dimension_numbers<[1], [0], [0], [1], [0, 0, 1, 1], [], []>} : vector<16x32xf32>, vector<32x32xf32>, vector<16x32xf32> -> vector<16x32xf32>
    %c0_5 = arith.constant 0 : index
    %c0_6 = arith.constant 0 : index
    %7 = vector.load %arg7[%c0_5, %c0_6] : memref<1x32xf32, #tpu.memory_space<vmem>>, vector<1x32xf32>
    %8 = vector.broadcast %7 : vector<1x32xf32> to vector<16x32xf32>
    %9 = arith.addf %6, %8 : vector<16x32xf32>
    %10 = vector.shape_cast %9 : vector<16x32xf32> to vector<2x8x32xf32>
    %c0_7 = arith.constant 0 : index
    %c0_8 = arith.constant 0 : index
    %c0_9 = arith.constant 0 : index
    %11 = vector.load %arg11[%c0_7, %c0_8, %c0_9] : memref<2x8x32xf32, #tpu.memory_space<vmem>>, vector<2x8x32xf32>
    "tpu.trace_start"() <{level = 10 : i32, message = "bqm,bkm->bqk"}> : () -> ()
    %cst_10 = arith.constant dense<0.000000e+00> : vector<2x8x8xf32>
    %12 = tpu.matmul %10, %11, %cst_10 {dimension_numbers = #tpu.dot_dimension_numbers<[2], [2], [1], [1], [0, 0, 0, 1, 1, 1], [0], [0]>} : vector<2x8x32xf32>, vector<2x8x32xf32>, vector<2x8x8xf32> -> vector<2x8x8xf32>
    "tpu.trace_stop"() : () -> ()
    %c0_11 = arith.constant 0 : index
    %c0_12 = arith.constant 0 : index
    %c0_13 = arith.constant 0 : index
    %13 = vector.load %arg5[%c0_11, %c0_12, %c0_13] : memref<2x1x8xf32, #tpu.memory_space<vmem>>, vector<2x1x8xf32>
    %cst_14 = arith.constant 2.32830644E-10 : f32
    %14 = vector.broadcast %cst_14 : f32 to vector<2x1x8xf32>
    %15 = arith.mulf %13, %14 : vector<2x1x8xf32>
    %cst_15 = arith.constant 1.000000e+00 : f32
    %16 = vector.broadcast %cst_15 : f32 to vector<2x1x8xf32>
    %17 = arith.addf %16, %15 : vector<2x1x8xf32>
    %18 = vector.broadcast %17 : vector<2x1x8xf32> to vector<2x8x8xf32>
    %19 = arith.mulf %12, %18 : vector<2x8x8xf32>
    %20 = vector.broadcast %13 : vector<2x1x8xf32> to vector<2x8x8xf32>
    %21 = arith.addf %19, %20 : vector<2x8x8xf32>
    %cst_16 = arith.constant dense<0xFF800000> : vector<2x8xf32>
    %22 = vector.multi_reduction <maximumf>, %21, %cst_16 [2] : vector<2x8x8xf32> to vector<2x8xf32>
    %23 = vector.shape_cast %22 : vector<2x8xf32> to vector<2x8x1xf32>
    %24 = vector.broadcast %23 : vector<2x8x1xf32> to vector<2x8x8xf32>
    %25 = arith.subf %21, %24 : vector<2x8x8xf32>
    %26 = math.exp %25 : vector<2x8x8xf32>
    %cst_17 = arith.constant dense<0.000000e+00> : vector<2x8xf32>
    %27 = vector.multi_reduction <add>, %26, %cst_17 [2] : vector<2x8x8xf32> to vector<2x8xf32>
    %28 = vector.shape_cast %27 : vector<2x8xf32> to vector<2x8x1xf32>
    %c0_18 = arith.constant 0 : index
    %c0_19 = arith.constant 0 : index
    %c0_20 = arith.constant 0 : index
    %29 = vector.load %arg4[%c0_18, %c0_19, %c0_20] : memref<2x8x32xf32, #tpu.memory_space<vmem>>, vector<2x8x32xf32>
    "tpu.trace_start"() <{level = 10 : i32, message = "bqk,bkv->bqv"}> : () -> ()
    %cst_21 = arith.constant dense<0.000000e+00> : vector<2x8x32xf32>
    %30 = tpu.matmul %26, %29, %cst_21 {dimension_numbers = #tpu.dot_dimension_numbers<[2], [1], [1], [2], [0, 0, 0, 1, 1, 2], [0], [0]>} : vector<2x8x8xf32>, vector<2x8x32xf32>, vector<2x8x32xf32> -> vector<2x8x32xf32>
    "tpu.trace_stop"() : () -> ()
    %31 = tpu.reciprocal %28 : vector<2x8x1xf32> -> vector<2x8x1xf32>
    %32 = vector.broadcast %31 : vector<2x8x1xf32> to vector<2x8x32xf32>
    %33 = arith.mulf %30, %32 : vector<2x8x32xf32>
    %c0_22 = arith.constant 0 : index
    %c0_23 = arith.constant 0 : index
    %c0_24 = arith.constant 0 : index
    %34 = vector.load %arg10[%c0_22, %c0_23, %c0_24] : memref<2x8x32xf32, #tpu.memory_space<vmem>>, vector<2x8x32xf32>
    tpu.vector_store %arg10[%c0_22, %c0_23, %c0_24], %33 {strides = array<i32>} : memref<2x8x32xf32, #tpu.memory_space<vmem>>, vector<2x8x32xf32>,
    return
  }
  func.func @transform_0(%arg0: i32, %arg1: i32) -> (i32, i32, i32) {
    %c0_i32 = arith.constant 0 : i32
    %c0_i32_0 = arith.constant 0 : i32
    return %arg0, %arg1, %c0_i32 : i32, i32, i32
  }
  func.func @transform_1(%arg0: i32, %arg1: i32) -> (i32, i32, i32) {
    %c0_i32 = arith.constant 0 : i32
    %c0_i32_0 = arith.constant 0 : i32
    %c0_i32_1 = arith.constant 0 : i32
    return %arg0, %c0_i32, %c0_i32_0 : i32, i32, i32
  }
  func.func @transform_2(%arg0: i32, %arg1: i32) -> (i32, i32, i32) {
    %c0_i32 = arith.constant 0 : i32
    %c0_i32_0 = arith.constant 0 : i32
    %c0_i32_1 = arith.constant 0 : i32
    return %arg0, %c0_i32, %c0_i32_0 : i32, i32, i32
  }
  func.func @transform_3(%arg0: i32, %arg1: i32) -> (i32, i32, i32) {
    %c0_i32 = arith.constant 0 : i32
    %c0_i32_0 = arith.constant 0 : i32
    %c0_i32_1 = arith.constant 0 : i32
    return %arg0, %c0_i32, %c0_i32_0 : i32, i32, i32
  }
  func.func @transform_4(%arg0: i32, %arg1: i32) -> (i32, i32) {
    %c0_i32 = arith.constant 0 : i32
    %c0_i32_0 = arith.constant 0 : i32
    %c0_i32_1 = arith.constant 0 : i32
    return %c0_i32, %c0_i32_0 : i32, i32
  }
  func.func @transform_5(%arg0: i32, %arg1: i32) -> (i32, i32) {
    %c0_i32 = arith.constant 0 : i32
    %c0_i32_0 = arith.constant 0 : i32
    %c0_i32_1 = arith.constant 0 : i32
    return %c0_i32, %c0_i32_0 : i32, i32
  }
  func.func @transform_6(%arg0: i32, %arg1: i32) -> (i32, i32) {
    %c0_i32 = arith.constant 0 : i32
    %c0_i32_0 = arith.constant 0 : i32
    %c0_i32_1 = arith.constant 0 : i32
    return %c0_i32, %c0_i32_0 : i32, i32
  }
  func.func @transform_7(%arg0: i32, %arg1: i32) -> (i32, i32) {
    %c0_i32 = arith.constant 0 : i32
    %c0_i32_0 = arith.constant 0 : i32
    %c0_i32_1 = arith.constant 0 : i32
    return %c0_i32, %c0_i32_0 : i32, i32
  }
  func.func @transform_8(%arg0: i32, %arg1: i32) -> (i32, i32, i32) {
    %c0_i32 = arith.constant 0 : i32
    %c0_i32_0 = arith.constant 0 : i32
    return %arg0, %arg1, %c0_i32 : i32, i32, i32
  }
}

</mosaic_0001>

<bundles_post_ra>
// kernel: tpu_custom_call.1
= control target key start
LH: loop header
LB: loop body
LE: loop exit
PB: predicated region body
PF: predicated region fallthrough
CT: control target
= control target key end

     0   :  { %13 = vsyncpa [#allocation4], 0  ;;  %s1115_s0 = inlined_call_operand.hbm [shape: f32[2,8,32], index: 0, kind: input, shape index: {}]   ;;  %s1116_s1 = inlined_call_operand.hbm [shape: f32[2,8,32], index: 1, kind: input, shape index: {}]   ;;  %s1117_s2 = inlined_call_operand.hbm [shape: f32[2,8,32], index: 2, kind: input, shape index: {}]   ;;  %s1118_s3 = inlined_call_operand.vmem [shape: f32[2,1,8], index: 3, kind: input, shape index: {}]   ;;  %s1119_s4 = inlined_call_operand.hbm [shape: f32[32,32], index: 4, kind: input, shape index: {}]   ;;  %s1120_s5 = inlined_call_operand.vmem [shape: f32[1,32], index: 5, kind: input, shape index: {}]   ;;  %s1121_s6 = inlined_call_operand.hbm [shape: f32[32,32], index: 6, kind: input, shape index: {}]   ;;  %s1122_s7 = inlined_call_operand.vmem [shape: f32[1,32], index: 7, kind: input, shape index: {}]   ;;  %s1123_s8 = inlined_call_operand.hbm [shape: f32[2,8,32], index: 8, kind: output, shape index: {}]  }
   0x1   :  { %14 = vsyncpa [#allocation7], 0 }
   0x2   :  { %15 = vsyncpa [#allocation10], 0 }
   0x3   :  { %16 = vsyncpa [#allocation5], 0  ;;  %s922_s27 = smov [#allocation6]   ;;  %s923_s29 = smov [#allocation9]  }
   0x4   :  { %s34_s28 = sshll.u32 %s922_s27, 4  ;;  %s60_s30 = sshll.u32 %s923_s29, 4  ;;  %s35_s28 = int_to_ptr.vmem [resolvable:$true] %s34_s28  ;;  %s977_s30 = int_to_ptr.vmem [resolvable:$true] %s60_s30 }
   0x5   :  { %s782_s11 = scalar_lea.hbm %s1116_s1, 256 }
   0x6   :  { %p783_p0 = scmp.ne.s32.totalorder %s1116_s1, %s782_s11  ;;  %p786_p1 = scmp.lt.u32.totalorder %s782_s11, %s1116_s1 }
   0x8   :  { %p788_p2 = pnand %p786_p1, %p783_p0 }
   0xa   :  { %791 = shalt.err (!%p788_p2)
}
   0xb   :  { %s792_s16 = scalar_lea.vmem %s35_s28, 256  ;;  %p797_p4 = scmp.lt.s32.totalorder %s35_s28, %s35_s28 }
   0xc   :  { %p793_p3 = scmp.ne.s32.totalorder %s35_s28, %s792_s16  ;;  %p798_p5 = scmp.lt.s32.totalorder %s792_s16, %s792_s16 }
   0xe   :  { %p799_p6 = por %p798_p5, %p797_p4 }
  0x10   :  { %p800_p7 = pnand %p799_p6, %p793_p3 }
  0x12   :  { %803 = shalt.err (!%p800_p7)
}
  0x13   :  { %s924_s17 = smov 128   ;;  %s925_s18 = smov 8  }
  0x14   :  { %40 = dma.hbm_to_vmem [thread:$0]  %s1116_s1, 256, %s35_s28, [#allocation7], %s924_s17, %s924_s17, %s925_s18  }
  0x15   :  { %s804_s23 = scalar_lea.hbm %s1119_s4, 512 }
  0x16   :  { %p805_p8 = scmp.ne.s32.totalorder %s1119_s4, %s804_s23  ;;  %p808_p9 = scmp.lt.u32.totalorder %s804_s23, %s1119_s4 }
  0x18   :  { %p810_p10 = pnand %p808_p9, %p805_p8 }
  0x1a   :  { %813 = shalt.err (!%p810_p10)
}
  0x1b   :  { %s814_s29 = scalar_lea.vmem %s977_s30, 512  ;;  %p819_p12 = scmp.lt.s32.totalorder %s977_s30, %s977_s30 }
  0x1c   :  { %p815_p11 = scmp.ne.s32.totalorder %s977_s30, %s814_s29  ;;  %p820_p13 = scmp.lt.s32.totalorder %s814_s29, %s814_s29 }
  0x1e   :  { %p821_p0 = por %p820_p13, %p819_p12 }
  0x20   :  { %p822_p1 = pnand %p821_p0, %p815_p11 }
  0x22   :  { %825 = shalt.err (!%p822_p1)
}
  0x23   :  { %66 = dma.hbm_to_vmem [thread:$0]  %s1119_s4, 512, %s977_s30, [#allocation10], %s924_s17, %s924_s17, %s925_s18  }
  0x24   :  { %s926_s9 = smov [#allocation3]   ;;  %s927_s11 = smov [#allocation8]  }
  0x25   :  { %s22_s10 = sshll.u32 %s926_s9, 4  ;;  %s46_s12 = sshll.u32 %s927_s11, 4  ;;  %s23_s10 = int_to_ptr.vmem [resolvable:$true] %s22_s10  ;;  %s1014_s12 = int_to_ptr.vmem [resolvable:$true] %s46_s12 }
  0x26   :  { %s826_s15 = scalar_lea.hbm %s1115_s0, 256 }
  0x27   :  { %p827_p2 = scmp.ne.s32.totalorder %s1115_s0, %s826_s15  ;;  %p830_p3 = scmp.lt.u32.totalorder %s826_s15, %s1115_s0 }
  0x29   :  { %p832_p4 = pnand %p830_p3, %p827_p2 }
  0x2b   :  { %835 = shalt.err (!%p832_p4)
}
  0x2c   :  { %s836_s4 = scalar_lea.vmem %s23_s10, 256  ;;  %p841_p6 = scmp.lt.s32.totalorder %s23_s10, %s23_s10 }
  0x2d   :  { %p837_p5 = scmp.ne.s32.totalorder %s23_s10, %s836_s4  ;;  %p842_p7 = scmp.lt.s32.totalorder %s836_s4, %s836_s4 }
  0x2f   :  { %p843_p8 = por %p842_p7, %p841_p6 }
  0x31   :  { %p844_p9 = pnand %p843_p8, %p837_p5 }
  0x33   :  { %847 = shalt.err (!%p844_p9)
}
  0x34   :  { %28 = dma.hbm_to_vmem [thread:$0]  %s1115_s0, 256, %s23_s10, [#allocation4], %s924_s17, %s924_s17, %s925_s18  }
  0x35   :  { %s848_s25 = scalar_lea.hbm %s1117_s2, 256 }
  0x36   :  { %p849_p10 = scmp.ne.s32.totalorder %s1117_s2, %s848_s25  ;;  %p852_p11 = scmp.lt.u32.totalorder %s848_s25, %s1117_s2 }
  0x38   :  { %p854_p12 = pnand %p852_p11, %p849_p10 }
  0x3a   :  { %857 = shalt.err (!%p854_p12)
}
  0x3b   :  { %s858_s28 = scalar_lea.vmem %s1014_s12, 256  ;;  %p863_p0 = scmp.lt.s32.totalorder %s1014_s12, %s1014_s12 }
  0x3c   :  { %p859_p13 = scmp.ne.s32.totalorder %s1014_s12, %s858_s28  ;;  %p864_p1 = scmp.lt.s32.totalorder %s858_s28, %s858_s28 }
  0x3e   :  { %p865_p2 = por %p864_p1, %p863_p0 }
  0x40   :  { %p866_p3 = pnand %p865_p2, %p859_p13 }
  0x42   :  { %869 = shalt.err (!%p866_p3)
}
  0x43   :  { %52 = dma.hbm_to_vmem [thread:$0]  %s1117_s2, 256, %s1014_s12, [#allocation7], %s924_s17, %s924_s17, %s925_s18  }
  0x44   :  { %s928_s10 = smov [#allocation11]   ;;  %s870_s15 = scalar_lea.hbm %s1121_s6, 512 }
  0x45   :  { %s74_s11 = sshll.u32 %s928_s10, 4  ;;  %p871_p4 = scmp.ne.s32.totalorder %s1121_s6, %s870_s15  ;;  %s75_s11 = int_to_ptr.vmem [resolvable:$true] %s74_s11 }
  0x46   :  { %p874_p5 = scmp.lt.u32.totalorder %s870_s15, %s1121_s6 }
  0x48   :  { %p876_p6 = pnand %p874_p5, %p871_p4 }
  0x4a   :  { %879 = shalt.err (!%p876_p6)
}
  0x4b   :  { %s880_s4 = scalar_lea.vmem %s75_s11, 512  ;;  %p885_p8 = scmp.lt.s32.totalorder %s75_s11, %s75_s11 }
  0x4c   :  { %p881_p7 = scmp.ne.s32.totalorder %s75_s11, %s880_s4  ;;  %p886_p9 = scmp.lt.s32.totalorder %s880_s4, %s880_s4 }
  0x4e   :  { %p887_p10 = por %p886_p9, %p885_p8 }
  0x50   :  { %p888_p11 = pnand %p887_p10, %p881_p7 }
  0x52   :  { %891 = shalt.err (!%p888_p11)
}
  0x53   :  { %80 = dma.hbm_to_vmem [thread:$0]  %s1121_s6, 512, %s75_s11, [#allocation10], %s924_s17, %s924_s17, %s925_s18  }
  0x54   :  { %914 = dma.done.wait [#allocation4], 256  }
  0x55   :  { %915 = vsyncadd [#allocation4], 4294967040 }
  0x56   :  { %916 = dma.done.wait [#allocation7], 512  }
  0x57   :  { %917 = vsyncadd [#allocation7], 4294966784 }
  0x58   :  { %918 = dma.done.wait [#allocation10], 1024  }
  0x59   :  { %919 = vsyncadd [#allocation10], 4294966272  ;;  %vm115_vm0 = vcmask 261120   ;;  %v104_v0 = vld [vmem:[#allocation11] sm:$0xff]  ;;  %v105_v1 = vld [vmem:[#allocation11 + $0x8] sm:$0xff]  ;;  %v929_v16 = vmov 0.0   ;;  %v456_v29 = vlaneseq }
  0x5a   :  { %v106_v2 = vld [vmem:[#allocation11 + $0x10] sm:$0xff]  ;;  %v748_v3 = vpack.c.bf16 %v105_v1, %v104_v0  ;;  %v107_v4 = vld [vmem:[#allocation11 + $0x18] sm:$0xff]  ;;  %v102_v5 = vld [vmem:[#allocation6] sm:$0xff]  ;;  %vm930_vm1 = vmmov 0   ;;  %vm482_vm2 = vcmask 64512  }
  0x5b   :  { %v752_v6 = vpack.c.bf16 %v107_v4, %v106_v2  ;;  %714 = vmatprep.mubr.msk.f32.mxu0 %vm115_vm0, %v102_v5  ;;  %v201_v7 = vld [vmem:[#allocation9] sm:$0xff]  ;;  %v202_v8 = vld [vmem:[#allocation9 + $0x8] sm:$0xff]  ;;  %v203_v9 = vld [vmem:[#allocation9 + $0x10] sm:$0xff]  ;;  %v457_v33 = vshrl.u32 %v456_v29, 7 }
  0x5c   :  { %749 = vmatprep.subr.bf16.mxu0 %v748_v3  ;;  %v756_v10 = vpack.c.bf16 %v202_v8, %v201_v7  ;;  %v204_v11 = vld [vmem:[#allocation9 + $0x18] sm:$0xff]  ;;  %v199_v12 = vld [vmem:[#allocation3] sm:$0xff]  ;;  %v103_v14 = vld [vmem:[#allocation6 + $0x8] sm:$0xff] }
  0x5d   :  { %751 = vmatpush3.bf16.msra.mxu0 %v748_v3  ;;  %v760_v13 = vpack.c.bf16 %v204_v11, %v203_v9  ;;  %725 = vmatprep.mubr.msk.f32.mxu1 %vm115_vm0, %v199_v12  ;;  %v200_v15 = vld [vmem:[#allocation3 + $0x8] sm:$0xff]  ;;  %v674_v17 = vld [vmem:[%s1122_s7] ss:$0 sm:$0xff]  ;;  %v449_v30 = vld [vmem:[%s1118_s3 + $0x1] sm:$0x1]  ;;  %v458_v36 = vsub.s32 0, %v457_v33 }
  0x5e   :  { %753 = vmatprep.subr.bf16.mxu0 %v752_v6  ;;  %757 = vmatprep.subr.bf16.mxu1 %v756_v10  ;;  %v677_v24 = vld [vmem:[%s1120_s5] ss:$0 sm:$0xff]  ;;  %v451_v32 = vmul.f32 2.3283064e-10, %v449_v30  ;;  %v501_v52 = vld [vmem:[#allocation8] sm:$0xff]  ;;  %v502_v53 = vld [vmem:[#allocation8 + $0x8] sm:$0xff] }
  0x5f   :  { %759 = vmatpush3.bf16.msra.mxu1 %v756_v10  ;;  %v448_v31 = vld [vmem:[%s1118_s3] sm:$0x1]  ;;  %v477_v47 = vrot.slane %v449_v30, %v458_v36  ;;  %s931_s3 = smov [#allocation12]  }
  0x60   :  { %761 = vmatprep.subr.bf16.mxu1 %v760_v13  ;;  %v450_v34 = vmul.f32 2.3283064e-10, %v448_v31  ;;  %v453_v35 = vadd.f32 1.0, %v451_v32  ;;  %v473_v41 = vrot.slane %v448_v31, %v458_v36  ;;  %s660_s26 = sshll.u32 %s931_s3, 4  ;;  %s661_s26 = int_to_ptr.vmem [resolvable:$true] %s660_s26 }
  0x61   :  { %755 = vmatpush3.bf16.msra.mxu0 %v752_v6  ;;  %s892_s27 = scalar_lea.vmem %s661_s26, 256  ;;  %p897_p13 = scmp.lt.s32.totalorder %s661_s26, %s661_s26 }
  0x62   :  { %728 = vmatprep.subr.mxu0 %v929_v16  ;;  %v452_v37 = vadd.f32 1.0, %v450_v34  ;;  %v463_v38 = vrot.slane %v453_v35, %v458_v36  ;;  %p893_p12 = scmp.ne.s32.totalorder %s661_s26, %s892_s27  ;;  %p898_p0 = scmp.lt.s32.totalorder %s892_s27, %s892_s27 }
  0x63   :  { %763 = vmatpush3.bf16.msra.mxu1 %v760_v13 }
  0x64   :  { %715 = vmatmul.mubr.msk.f32.vlgmr.msra.gmra.mrb[0].mxu0 %vm115_vm0, %v103_v14  ;;  %733 = vmatprep.subr.mxu1 %v929_v16  ;;  %v459_v39 = vrot.slane %v452_v37, %v458_v36  ;;  %p899_p1 = por %p898_p0, %p897_p13 }
  0x65   :  { %730 = vmatprep.mubr.msk.f32.mxu0 %vm930_vm1, %v929_v16 }
  0x66   :  { %726 = vmatmul.mubr.msk.f32.vlgmr.msra.gmra.mrb[0].mxu1 %vm115_vm0, %v200_v15  ;;  %p900_p2 = pnand %p899_p1, %p893_p12 }
  0x67   :  { %735 = vmatprep.mubr.msk.f32.mxu1 %vm930_vm1, %v929_v16 }
 0x137   :  { %v716_v18 = vpop.f32.mrb[0].mxu0 }
 0x138   :  { %v194_v19 = vadd.f32 %v716_v18, %v674_v17  ;;  %v188_v20 = vpop.f32.mrb[1].mxu0 }
 0x139   :  { %v189_v21 = vadd.f32 %v674_v17, %v188_v20  ;;  %v727_v22 = vpop.f32.mrb[0].mxu1 }
 0x13a   :  { %198 = vst.msk [vmem:[#allocation2 + $0x8] sm:$0xff] %vm115_vm0, %v194_v19  ;;  %v285_v23 = vpop.f32.mrb[1].mxu1  ;;  %v291_v25 = vadd.f32 %v727_v22, %v677_v24 }
 0x13b   :  { %197 = vst.msk [vmem:[#allocation2] sm:$0xff] %vm115_vm0, %v189_v21  ;;  %v286_v27 = vadd.f32 %v677_v24, %v285_v23 }
 0x141   :  { %v295_v26 = vld [vmem:[#allocation2 + $0x8] sm:$0xff] }
 0x142   :  { %734 = vmatpush3.xpose.msk.msra.mxu1 %vm115_vm0, %v295_v26  ;;  %v294_v28 = vld [vmem:[#allocation2] sm:$0xff] }
 0x143   :  { %729 = vmatpush3.xpose.msk.msra.mxu0 %vm115_vm0, %v294_v28  ;;  %743 = vmatprep.subr.mxu1 %v929_v16 }
 0x144   :  { %738 = vmatprep.subr.mxu0 %v929_v16 }
 0x145   :  { %736 = vmatmul.mubr.msk.f32.vlgmr.msra.gmra.mrb[2].mxu1 %vm115_vm0, %v291_v25 }
 0x146   :  { %731 = vmatmul.mubr.msk.f32.vlgmr.msra.gmra.mrb[2].mxu0 %vm115_vm0, %v286_v27  ;;  %745 = vmatprep.mubr.msk.f32.mxu1 %vm930_vm1, %v929_v16 }
 0x147   :  { %740 = vmatprep.mubr.msk.f32.mxu0 %vm930_vm1, %v929_v16  ;;  %739 = vmatpush3.msra.mxu0 %v501_v52 }
 0x148   :  { %744 = vmatpush3.msra.mxu1 %v502_v53 }
 0x218   :  { %v444_v40 = vpop.f32.mrb[2].mxu1 }
 0x219   :  { %v368_v42 = vpop.f32.mrb[2].mxu0  ;;  %v737_v43 = vpop.f32.mrb[3].mxu1  ;;  %v467_v44 = vmul.f32 %v463_v38, %v444_v40 }
 0x21a   :  { %v466_v45 = vmul.f32 %v459_v39, %v368_v42  ;;  %v732_v46 = vpop.f32.mrb[3].mxu0 }
 0x21b   :  { %v481_v50 = vadd.f32 %v477_v47, %v467_v44 }
 0x21c   :  { %v480_v48 = vadd.f32 %v473_v41, %v466_v45 }
 0x21d   :  { %v486_v51 = vsel %vm482_vm2, %v481_v50, -inf }
 0x21e   :  { %v483_v49 = vsel %vm482_vm2, %v480_v48, -inf }
 0x21f   :  { %484 = vmax.xlane.f32.xlu0 %v483_v49 }
 0x223   :  { %487 = vmax.xlane.f32.xlu0 %v486_v51 }
 0x2ac   :  { %v485_v54 = vpop.xlane.xlu0 %484 }
 0x2ad   :  { %v489_v55 = vsub.f32 %v480_v48, %v485_v54 }
 0x2af   :  { %v491_v56 = vmul.f32 1.442695, %v489_v55 }
 0x2b0   :  { %v488_v57 = vpop.xlane.xlu0 %487 }
 0x2b1   :  { %774 = vpow2.f32 %v491_v56  ;;  %v490_v58 = vsub.f32 %v481_v50, %v488_v57 }
 0x2b3   :  { %v493_v59 = vmul.f32 1.442695, %v490_v58 }
 0x2b5   :  { %776 = vpow2.f32 %v493_v59 }
 0x2bb   :  { %v775_v60 = vpop.eup %774 }
 0x2bc   :  { %741 = vmatmul.mubr.msk.f32.vlgmr.msra.gmra.mrb[4].mxu0 %vm482_vm2, %v775_v60  ;;  %v495_v61 = vsel %vm482_vm2, %v775_v60, 0.0 }
 0x2bd   :  { %496 = vadd.xlane.f32.xlu1 %v495_v61 }
 0x2bf   :  { %v777_v62 = vpop.eup %776 }
 0x2c0   :  { %746 = vmatmul.mubr.msk.f32.vlgmr.msra.gmra.mrb[4].mxu1 %vm482_vm2, %v777_v62  ;;  %v498_v63 = vsel %vm482_vm2, %v777_v62, 0.0 }
 0x2c1   :  { %499 = vadd.xlane.f32.xlu1 %v498_v63 }
 0x34a   :  { %v497_v0 = vpop.xlane.xlu1 %496 }
 0x34b   :  { %778 = vrcp.f32 %v497_v0 }
 0x34e   :  { %v500_v1 = vpop.xlane.xlu1 %499 }
 0x34f   :  { %780 = vrcp.f32 %v500_v1 }
 0x355   :  { %v779_v2 = vpop.eup %778 }
 0x359   :  { %v781_v6 = vpop.eup %780 }
 0x38f   :  { %v572_v3 = vpop.f32.mrb[4].mxu0 }
 0x390   :  { %v651_v4 = vmul.f32 %v779_v2, %v572_v3  ;;  %v742_v5 = vpop.f32.mrb[5].mxu0 }
 0x392   :  { %653 = vst.msk [vmem:[#allocation12] sm:$0xff] %vm115_vm0, %v651_v4 }
 0x393   :  { %v645_v7 = vpop.f32.mrb[4].mxu1 }
 0x394   :  { %v652_v8 = vmul.f32 %v781_v6, %v645_v7  ;;  %v747_v9 = vpop.f32.mrb[5].mxu1 }
 0x396   :  { %654 = vst.msk [vmem:[#allocation12 + $0x8] sm:$0xff] %vm115_vm0, %v652_v8 }
 0x397   :  { %903 = shalt.err (!%p900_p2)
}
 0x398   :  { %s904_s28 = scalar_lea.hbm %s1123_s8, 256 }
 0x399   :  { %p905_p3 = scmp.ne.s32.totalorder %s1123_s8, %s904_s28  ;;  %p908_p4 = scmp.lt.u32.totalorder %s904_s28, %s1123_s8 }
 0x39b   :  { %p910_p5 = pnand %p908_p4, %p905_p3 }
 0x39d   :  { %913 = shalt.err (!%p910_p5)
}
 0x39e   :  { %666 = dma.vmem_to_hbm [thread:$0]  %s661_s26, 256, %s1123_s8, [#allocation5], %s924_s17, %s924_s17, %s925_s18  }
 0x39f   :  { %920 = dma.done.wait [#allocation5], 256  }
 0x3a0   :  { %921 = vsyncadd [#allocation5], 4294967040 }
 0x3a1   :  { %670 = vsyncpa [#allocation4], 1 }
 0x3a2   :  { %671 = vsyncpa [#allocation7], 1 }
 0x3a3   :  { %672 = vsyncpa [#allocation10], 1 }
 0x3a4   :  { %673 = vsyncpa [#allocation5], 1 }

</bundles_post_ra>
